<compile_context>
chip_gen: v7x
topology: tpu7x:2x2x1
jax: 0.10.0
libtpu: 0.0.40
codegen_flags: <defaults>
</compile_context>

<pallas_src>
import functools

import numpy as np

import jax
import jax.numpy as jnp
from jax.experimental import pallas as pl
from jax.experimental.pallas import tpu as pltpu


# --------------------------------------------------------------------------- #
# Kernel 1: global avg+max pool over h*w  ->  tiny fc  ->  pairwise softmax.   #
# Grid: (batch, hw_tiles); hw is the reduction ("arbitrary") axis.             #
# --------------------------------------------------------------------------- #
def _make_pool_fc_kernel(hw: int, hw_tile: int):
    exact = (hw % hw_tile == 0)

    def kernel(x0_ref, x1_ref, w1lt_ref, w1rt_ref, b1_ref, wd_ref, bd_ref,
               alph_ref, sum0, sum1, max0, max1):
        j = pl.program_id(1)

        @pl.when(j == 0)
        def _init():
            zeros = jnp.zeros(sum0.shape, sum0.dtype)
            ninf = jnp.full(max0.shape, -jnp.inf, max0.dtype)
            sum0[...] = zeros
            sum1[...] = zeros
            max0[...] = ninf
            max1[...] = ninf

        x0 = x0_ref[...].astype(jnp.float32)
        x1 = x1_ref[...].astype(jnp.float32)

        if exact:
            m0, m1 = x0, x1
        else:
            # Mask the out-of-bounds columns of the tail tile.
            col = jax.lax.broadcasted_iota(jnp.int32, x0.shape, 1) + j * hw_tile
            mask = col < hw
            ninf = jnp.float32(-jnp.inf)
            m0 = jnp.where(mask, x0, ninf)
            m1 = jnp.where(mask, x1, ninf)
            x0 = jnp.where(mask, x0, 0.0)
            x1 = jnp.where(mask, x1, 0.0)

        sum0[...] += x0
        sum1[...] += x1
        max0[...] = jnp.maximum(max0[...], m0)
        max1[...] = jnp.maximum(max1[...], m1)

        @pl.when(j == pl.num_programs(1) - 1)
        def _finalize():
            inv_hw = jnp.float32(1.0 / hw)
            # GAP + GMP per channel, kept channel-on-sublane: (C, 1).
            p0 = (sum0[...].sum(axis=1, keepdims=True) * inv_hw
                  + max0[...].max(axis=1, keepdims=True))
            p1 = (sum1[...].sum(axis=1, keepdims=True) * inv_hw
                  + max1[...].max(axis=1, keepdims=True))
            # fc layer 1: channel-concat folded into two weight halves; done as
            # broadcast-multiply + reduce (the matrices are tiny -> VPU/XLU).
            h = (w1lt_ref[...] * p0 + w1rt_ref[...] * p1).sum(
                axis=0, keepdims=True) + b1_ref[...]              # (1, hidden)
            # fc layer 2 folded to the softmax pair-difference:
            #   logit_i = y[2i] - y[2i+1]   ->   alpha_i = sigmoid(logit_i)
            logit = (wd_ref[...] * h).sum(axis=1, keepdims=True) + bd_ref[...]
            alph_ref[...] = jax.nn.sigmoid(logit).astype(alph_ref.dtype)

    return kernel


# --------------------------------------------------------------------------- #
# Kernel 2: f_fusion = x0 * alpha + x1 * (1 - alpha), tiled over h*w.           #
# --------------------------------------------------------------------------- #
def _fusion_kernel(x0_ref, x1_ref, alph_ref, o_ref):
    a = alph_ref[...].astype(jnp.float32)      # (C, 1) broadcasts over lanes
    x0 = x0_ref[...].astype(jnp.float32)
    x1 = x1_ref[...].astype(jnp.float32)
    o_ref[...] = (x0 * a + x1 * (1.0 - a)).astype(o_ref.dtype)


# --------------------------------------------------------------------------- #
# Helpers                                                                       #
# --------------------------------------------------------------------------- #
def _pick_hw_tile(hw: int, c: int, itemsize: int) -> int:
    """Largest lane tile (multiple of 128, or the full extent) keeping the
    per-step working set (x0/x1/out double-buffered + 4 f32 accumulators)
    comfortably inside the default scoped-VMEM budget on every TPU gen."""
    budget = 12 << 20
    per_col = c * (6 * itemsize + 4 * 4)
    if hw < 128 or hw * per_col <= budget:
        return hw                               # full-extent block is always legal
    tile = 512
    while tile > 128 and tile * per_col > budget:
        tile //= 2
    return max(128, min(tile, (hw // 128) * 128))


def prepare_mcff_params(fc1_w, fc1_b, fc2_w, fc2_b):
    """Fold the MCFF fc + softmax structure into kernel-friendly tensors.

    fc1_w: (c//r, 2c)   fc1_b: (c//r,)     [PyTorch nn.Linear layout]
    fc2_w: (2c, c//r)   fc2_b: (2c,)
    """
    hidden, two_c = fc1_w.shape
    c = two_c // 2
    f32 = jnp.float32
    return {
        # channel concat folded away: separate halves acting on x0 / x1 pools
        "w1lt": jnp.asarray(fc1_w[:, :c].T, f32),                 # (c, hidden)
        "w1rt": jnp.asarray(fc1_w[:, c:].T, f32),                 # (c, hidden)
        "b1":   jnp.asarray(fc1_b.reshape(1, hidden), f32),       # (1, hidden)
        # softmax over pairs (2i, 2i+1) == sigmoid(y[2i] - y[2i+1]):
        # fold the pair difference into the second layer.
        "wd":   jnp.asarray(fc2_w[0::2, :] - fc2_w[1::2, :], f32),            # (c, hidden)
        "bd":   jnp.asarray((fc2_b[0::2] - fc2_b[1::2]).reshape(c, 1), f32),  # (c, 1)
    }


# --------------------------------------------------------------------------- #
# Forward                                                                       #
# --------------------------------------------------------------------------- #
@functools.partial(jax.jit, static_argnames=("hw_tile",))
def mcff_forward(x0, x1, params, hw_tile=None):
    """MCFF forward.  x0, x1: (N, C, H, W) NCHW tensors of the same shape."""
    N, C, H, W = x0.shape
    assert x1.shape == x0.shape
    HW = H * W
    itemsize = x0.dtype.itemsize
    if hw_tile is None:
        hw_tile = _pick_hw_tile(HW, C, itemsize)
    n_hw = pl.cdiv(HW, hw_tile)

    x0f = x0.reshape(N, C, HW)      # free reshape, stays NCHW (no transpose)
    x1f = x1.reshape(N, C, HW)

    w1lt, w1rt, b1, wd, bd = (params[k] for k in ("w1lt", "w1rt", "b1", "wd", "bd"))
    hidden = w1lt.shape[1]

    x_spec = pl.BlockSpec((None, C, hw_tile), lambda b, j: (b, 0, j))
    a_spec = pl.BlockSpec((None, C, 1), lambda b, j: (b, 0, 0))

    def _full(shape):
        return pl.BlockSpec(shape, lambda b, j: (0, 0))

    # ---- kernel 1: pooling reduction + fc + pairwise softmax -> alpha ------- #
    alph = pl.pallas_call(
        _make_pool_fc_kernel(HW, hw_tile),
        out_shape=jax.ShapeDtypeStruct((N, C, 1), jnp.float32),
        grid_spec=pltpu.PrefetchScalarGridSpec(
            num_scalar_prefetch=0,
            grid=(N, n_hw),
            in_specs=[
                x_spec, x_spec,
                _full((C, hidden)), _full((C, hidden)), _full((1, hidden)),
                _full((C, hidden)), _full((C, 1)),
            ],
            out_specs=a_spec,
            scratch_shapes=[pltpu.VMEM((C, hw_tile), jnp.float32)] * 4,
        ),
        compiler_params=pltpu.CompilerParams(
            dimension_semantics=("parallel", "arbitrary")),
        cost_estimate=pl.CostEstimate(
            flops=6 * N * C * HW, transcendentals=N * C,
            bytes_accessed=2 * N * C * HW * itemsize),
    )(x0f, x1f, w1lt, w1rt, b1, wd, bd)

    # ---- kernel 2: out = x0 * alpha + x1 * (1 - alpha) ---------------------- #
    out = pl.pallas_call(
        _fusion_kernel,
        out_shape=jax.ShapeDtypeStruct((N, C, HW), x0.dtype),
        grid_spec=pltpu.PrefetchScalarGridSpec(
            num_scalar_prefetch=0,
            grid=(N, n_hw),
            in_specs=[x_spec, x_spec, a_spec],
            out_specs=x_spec,
        ),
        compiler_params=pltpu.CompilerParams(
            dimension_semantics=("parallel", "parallel")),
        cost_estimate=pl.CostEstimate(
            flops=3 * N * C * HW, transcendentals=0,
            bytes_accessed=3 * N * C * HW * itemsize),
    )(x0f, x1f, alph)

    return out.reshape(N, C, H, W)


# --------------------------------------------------------------------------- #
# NumPy (float64) reference of the PyTorch MCFF.forward                         #
# --------------------------------------------------------------------------- #
def _mcff_reference(x0, x1, fc1_w, fc1_b, fc2_w, fc2_b):
    bs, c, h, w = x0.shape
    feat = np.concatenate([x0, x1], axis=1)                     # (bs, 2c, h, w)
    pooled = feat.mean(axis=(2, 3)) + feat.max(axis=(2, 3))     # gap + gmp
    hdn = pooled @ fc1_w.T + fc1_b
    y = (hdn @ fc2_w.T + fc2_b).reshape(bs, c, 2)
    e = np.exp(y - y.max(axis=-1, keepdims=True))
    sm = e / e.sum(axis=-1, keepdims=True)
    alph = sm[..., 0][:, :, None, None]
    beta = sm[..., 1][:, :, None, None]
    return x0 * alph + x1 * beta


if __name__ == "__main__":
    key = jax.random.PRNGKey(0)
    k0, k1, kw1, kb1, kw2, kb2 = jax.random.split(key, 6)

    N, C, H, W, r = 2, 8, 16, 16, 2             # x = [x0, x1], each (N, C, H, W)
    hidden = C // r

    x0 = jax.random.normal(k0, (N, C, H, W), jnp.float32)
    x1 = jax.random.normal(k1, (N, C, H, W), jnp.float32)

    # PyTorch-layout fc parameters: Linear(2C -> C//r), Linear(C//r -> 2C)
    lim1, lim2 = 1.0 / np.sqrt(2 * C), 1.0 / np.sqrt(hidden)
    fc1_w = jax.random.uniform(kw1, (hidden, 2 * C), jnp.float32, -lim1, lim1)
    fc1_b = jax.random.uniform(kb1, (hidden,), jnp.float32, -lim1, lim1)
    fc2_w = jax.random.uniform(kw2, (2 * C, hidden), jnp.float32, -lim2, lim2)
    fc2_b = jax.random.uniform(kb2, (2 * C,), jnp.float32, -lim2, lim2)

    params = prepare_mcff_params(fc1_w, fc1_b, fc2_w, fc2_b)

    # Main config (auto tile: single full-extent hw tile).
    out = mcff_forward(x0, x1, params)
    jax.block_until_ready(out)
    assert out.shape == (N, C, H, W), out.shape

    ref = _mcff_reference(
        np.asarray(x0, np.float64), np.asarray(x1, np.float64),
        np.asarray(fc1_w, np.float64), np.asarray(fc1_b, np.float64),
        np.asarray(fc2_w, np.float64), np.asarray(fc2_b, np.float64))
    np.testing.assert_allclose(np.asarray(out, np.float64), ref, rtol=1e-4, atol=1e-4)

    # Also exercise the multi-step reduction + tail-masking path (HW=225, tile=128).
    x0b, x1b = x0[:, :, :15, :15], x1[:, :, :15, :15]
    out_b = mcff_forward(x0b, x1b, params, hw_tile=128)
    jax.block_until_ready(out_b)
    ref_b = _mcff_reference(
        np.asarray(x0b, np.float64), np.asarray(x1b, np.float64),
        np.asarray(fc1_w, np.float64), np.asarray(fc1_b, np.float64),
        np.asarray(fc2_w, np.float64), np.asarray(fc2_b, np.float64))
    np.testing.assert_allclose(np.asarray(out_b, np.float64), ref_b,
                               rtol=1e-4, atol=1e-4)

    print("KERNEL_OK")
</pallas_src>

<mosaic_0001>
module attributes {stable_mosaic.version = 11 : i64} {
  func.func @_fusion_kernel(%arg0: i32, %arg1: i32, %arg2: memref<1x8x256xf32, #tpu.memory_space<vmem>>, %arg3: memref<1x8x256xf32, #tpu.memory_space<vmem>>, %arg4: memref<1x8x1xf32, #tpu.memory_space<vmem>>, %arg5: memref<1x8x256xf32, #tpu.memory_space<vmem>>) attributes {dimension_semantics = [#tpu.dimension_semantics<parallel>, #tpu.dimension_semantics<parallel>], iteration_bounds = array<i64: 2, 1>, scalar_prefetch = 0 : i64, scratch_operands = 0 : i64, tpu.core_type = #tpu.core_type<tc>, window_params = [{transform_indices = @transform_0, window_bounds = array<i64: 1, 8, 256>}, {transform_indices = @transform_1, window_bounds = array<i64: 1, 8, 256>}, {transform_indices = @transform_2, window_bounds = array<i64: 1, 8, 1>}, {transform_indices = @transform_3, window_bounds = array<i64: 1, 8, 256>}]} {
    %c0 = arith.constant 0 : index
    %c0_0 = arith.constant 0 : index
    %c0_1 = arith.constant 0 : index
    %0 = vector.load %arg4[%c0, %c0_0, %c0_1] : memref<1x8x1xf32, #tpu.memory_space<vmem>>, vector<1x8x1xf32>
    %1 = vector.shape_cast %0 : vector<1x8x1xf32> to vector<8x1xf32>
    %c0_2 = arith.constant 0 : index
    %c0_3 = arith.constant 0 : index
    %c0_4 = arith.constant 0 : index
    %2 = vector.load %arg2[%c0_2, %c0_3, %c0_4] : memref<1x8x256xf32, #tpu.memory_space<vmem>>, vector<1x8x256xf32>
    %3 = vector.shape_cast %2 : vector<1x8x256xf32> to vector<8x256xf32>
    %c0_5 = arith.constant 0 : index
    %c0_6 = arith.constant 0 : index
    %c0_7 = arith.constant 0 : index
    %4 = vector.load %arg3[%c0_5, %c0_6, %c0_7] : memref<1x8x256xf32, #tpu.memory_space<vmem>>, vector<1x8x256xf32>
    %5 = vector.shape_cast %4 : vector<1x8x256xf32> to vector<8x256xf32>
    %6 = vector.broadcast %1 : vector<8x1xf32> to vector<8x256xf32>
    %7 = arith.mulf %3, %6 : vector<8x256xf32>
    %cst = arith.constant 1.000000e+00 : f32
    %8 = vector.broadcast %cst : f32 to vector<8x1xf32>
    %9 = arith.subf %8, %1 : vector<8x1xf32>
    %10 = vector.broadcast %9 : vector<8x1xf32> to vector<8x256xf32>
    %11 = arith.mulf %5, %10 : vector<8x256xf32>
    %12 = arith.addf %7, %11 : vector<8x256xf32>
    %c0_8 = arith.constant 0 : index
    %c0_9 = arith.constant 0 : index
    %c0_10 = arith.constant 0 : index
    %13 = vector.load %arg5[%c0_8, %c0_9, %c0_10] : memref<1x8x256xf32, #tpu.memory_space<vmem>>, vector<1x8x256xf32>
    %14 = vector.shape_cast %13 : vector<1x8x256xf32> to vector<8x256xf32>
    %15 = vector.shape_cast %12 : vector<8x256xf32> to vector<1x8x256xf32>
    tpu.vector_store %arg5[%c0_8, %c0_9, %c0_10], %15 {strides = array<i32>} : memref<1x8x256xf32, #tpu.memory_space<vmem>>, vector<1x8x256xf32>,
    return
  }
  func.func @transform_0(%arg0: i32, %arg1: i32) -> (i32, i32, i32) {
    %c0_i32 = arith.constant 0 : i32
    %c0_i32_0 = arith.constant 0 : i32
    return %arg0, %c0_i32, %arg1 : i32, i32, i32
  }
  func.func @transform_1(%arg0: i32, %arg1: i32) -> (i32, i32, i32) {
    %c0_i32 = arith.constant 0 : i32
    %c0_i32_0 = arith.constant 0 : i32
    return %arg0, %c0_i32, %arg1 : i32, i32, i32
  }
  func.func @transform_2(%arg0: i32, %arg1: i32) -> (i32, i32, i32) {
    %c0_i32 = arith.constant 0 : i32
    %c0_i32_0 = arith.constant 0 : i32
    %c0_i32_1 = arith.constant 0 : i32
    return %arg0, %c0_i32, %c0_i32_0 : i32, i32, i32
  }
  func.func @transform_3(%arg0: i32, %arg1: i32) -> (i32, i32, i32) {
    %c0_i32 = arith.constant 0 : i32
    %c0_i32_0 = arith.constant 0 : i32
    return %arg0, %c0_i32, %arg1 : i32, i32, i32
  }
}

module attributes {stable_mosaic.version = 11 : i64} {
  func.func @kernel(%arg0: i32, %arg1: i32, %arg2: memref<1x8x256xf32, #tpu.memory_space<vmem>>, %arg3: memref<1x8x256xf32, #tpu.memory_space<vmem>>, %arg4: memref<8x4xf32, #tpu.memory_space<vmem>>, %arg5: memref<8x4xf32, #tpu.memory_space<vmem>>, %arg6: memref<1x4xf32, #tpu.memory_space<vmem>>, %arg7: memref<8x4xf32, #tpu.memory_space<vmem>>, %arg8: memref<8x1xf32, #tpu.memory_space<vmem>>, %arg9: memref<1x8x1xf32, #tpu.memory_space<vmem>>, %arg10: memref<8x256xf32, #tpu.memory_space<vmem>>, %arg11: memref<8x256xf32, #tpu.memory_space<vmem>>, %arg12: memref<8x256xf32, #tpu.memory_space<vmem>>, %arg13: memref<8x256xf32, #tpu.memory_space<vmem>>) attributes {dimension_semantics = [#tpu.dimension_semantics<parallel>, #tpu.dimension_semantics<arbitrary>], iteration_bounds = array<i64: 2, 1>, scalar_prefetch = 0 : i64, scratch_operands = 4 : i64, tpu.core_type = #tpu.core_type<tc>, window_params = [{transform_indices = @transform_0, window_bounds = array<i64: 1, 8, 256>}, {transform_indices = @transform_1, window_bounds = array<i64: 1, 8, 256>}, {pipeline_mode = #tpu.pipeline_mode<synchronous>, transform_indices = @transform_2, window_bounds = array<i64: 8, 4>}, {pipeline_mode = #tpu.pipeline_mode<synchronous>, transform_indices = @transform_3, window_bounds = array<i64: 8, 4>}, {pipeline_mode = #tpu.pipeline_mode<synchronous>, transform_indices = @transform_4, window_bounds = array<i64: 1, 4>}, {pipeline_mode = #tpu.pipeline_mode<synchronous>, transform_indices = @transform_5, window_bounds = array<i64: 8, 4>}, {pipeline_mode = #tpu.pipeline_mode<synchronous>, transform_indices = @transform_6, window_bounds = array<i64: 8, 1>}, {transform_indices = @transform_7, window_bounds = array<i64: 1, 8, 1>}]} {
    %c0_i32 = arith.constant 0 : i32
    %0 = arith.cmpi eq, %arg1, %c0_i32 : i32
    %1 = arith.extui %0 : i1 to i32
    %c0_i32_0 = arith.constant 0 : i32
    %2 = arith.cmpi ne, %1, %c0_i32_0 : i32
    scf.if %2 {
      %cst = arith.constant 0.000000e+00 : f32
      %22 = vector.broadcast %cst : f32 to vector<8x256xf32>
      %cst_24 = arith.constant 0xFF800000 : f32
      %23 = vector.broadcast %cst_24 : f32 to vector<8x256xf32>
      %c0_25 = arith.constant 0 : index
      %c0_26 = arith.constant 0 : index
      %24 = vector.load %arg10[%c0_25, %c0_26] : memref<8x256xf32, #tpu.memory_space<vmem>>, vector<8x256xf32>
      tpu.vector_store %arg10[%c0_25, %c0_26], %22 {strides = array<i32>} : memref<8x256xf32, #tpu.memory_space<vmem>>, vector<8x256xf32>,
      %c0_27 = arith.constant 0 : index
      %c0_28 = arith.constant 0 : index
      %25 = vector.load %arg11[%c0_27, %c0_28] : memref<8x256xf32, #tpu.memory_space<vmem>>, vector<8x256xf32>
      tpu.vector_store %arg11[%c0_27, %c0_28], %22 {strides = array<i32>} : memref<8x256xf32, #tpu.memory_space<vmem>>, vector<8x256xf32>,
      %c0_29 = arith.constant 0 : index
      %c0_30 = arith.constant 0 : index
      %26 = vector.load %arg12[%c0_29, %c0_30] : memref<8x256xf32, #tpu.memory_space<vmem>>, vector<8x256xf32>
      tpu.vector_store %arg12[%c0_29, %c0_30], %23 {strides = array<i32>} : memref<8x256xf32, #tpu.memory_space<vmem>>, vector<8x256xf32>,
      %c0_31 = arith.constant 0 : index
      %c0_32 = arith.constant 0 : index
      %27 = vector.load %arg13[%c0_31, %c0_32] : memref<8x256xf32, #tpu.memory_space<vmem>>, vector<8x256xf32>
      tpu.vector_store %arg13[%c0_31, %c0_32], %23 {strides = array<i32>} : memref<8x256xf32, #tpu.memory_space<vmem>>, vector<8x256xf32>,
    } else {
    }
    %c0 = arith.constant 0 : index
    %c0_1 = arith.constant 0 : index
    %c0_2 = arith.constant 0 : index
    %3 = vector.load %arg2[%c0, %c0_1, %c0_2] : memref<1x8x256xf32, #tpu.memory_space<vmem>>, vector<1x8x256xf32>
    %4 = vector.shape_cast %3 : vector<1x8x256xf32> to vector<8x256xf32>
    %c0_3 = arith.constant 0 : index
    %c0_4 = arith.constant 0 : index
    %c0_5 = arith.constant 0 : index
    %5 = vector.load %arg3[%c0_3, %c0_4, %c0_5] : memref<1x8x256xf32, #tpu.memory_space<vmem>>, vector<1x8x256xf32>
    %6 = vector.shape_cast %5 : vector<1x8x256xf32> to vector<8x256xf32>
    %c0_6 = arith.constant 0 : index
    %c0_7 = arith.constant 0 : index
    %7 = vector.load %arg10[%c0_6, %c0_7] : memref<8x256xf32, #tpu.memory_space<vmem>>, vector<8x256xf32>
    %8 = arith.addf %7, %4 : vector<8x256xf32>
    %c0_8 = arith.constant 0 : index
    %c0_9 = arith.constant 0 : index
    %9 = vector.load %arg10[%c0_8, %c0_9] : memref<8x256xf32, #tpu.memory_space<vmem>>, vector<8x256xf32>
    tpu.vector_store %arg10[%c0_8, %c0_9], %8 {strides = array<i32>} : memref<8x256xf32, #tpu.memory_space<vmem>>, vector<8x256xf32>,
    %c0_10 = arith.constant 0 : index
    %c0_11 = arith.constant 0 : index
    %10 = vector.load %arg11[%c0_10, %c0_11] : memref<8x256xf32, #tpu.memory_space<vmem>>, vector<8x256xf32>
    %11 = arith.addf %10, %6 : vector<8x256xf32>
    %c0_12 = arith.constant 0 : index
    %c0_13 = arith.constant 0 : index
    %12 = vector.load %arg11[%c0_12, %c0_13] : memref<8x256xf32, #tpu.memory_space<vmem>>, vector<8x256xf32>
    tpu.vector_store %arg11[%c0_12, %c0_13], %11 {strides = array<i32>} : memref<8x256xf32, #tpu.memory_space<vmem>>, vector<8x256xf32>,
    %c0_14 = arith.constant 0 : index
    %c0_15 = arith.constant 0 : index
    %13 = vector.load %arg12[%c0_14, %c0_15] : memref<8x256xf32, #tpu.memory_space<vmem>>, vector<8x256xf32>
    %14 = arith.maximumf %13, %4 : vector<8x256xf32>
    %c0_16 = arith.constant 0 : index
    %c0_17 = arith.constant 0 : index
    %15 = vector.load %arg12[%c0_16, %c0_17] : memref<8x256xf32, #tpu.memory_space<vmem>>, vector<8x256xf32>
    tpu.vector_store %arg12[%c0_16, %c0_17], %14 {strides = array<i32>} : memref<8x256xf32, #tpu.memory_space<vmem>>, vector<8x256xf32>,
    %c0_18 = arith.constant 0 : index
    %c0_19 = arith.constant 0 : index
    %16 = vector.load %arg13[%c0_18, %c0_19] : memref<8x256xf32, #tpu.memory_space<vmem>>, vector<8x256xf32>
    %17 = arith.maximumf %16, %6 : vector<8x256xf32>
    %c0_20 = arith.constant 0 : index
    %c0_21 = arith.constant 0 : index
    %18 = vector.load %arg13[%c0_20, %c0_21] : memref<8x256xf32, #tpu.memory_space<vmem>>, vector<8x256xf32>
    tpu.vector_store %arg13[%c0_20, %c0_21], %17 {strides = array<i32>} : memref<8x256xf32, #tpu.memory_space<vmem>>, vector<8x256xf32>,
    %c0_i32_22 = arith.constant 0 : i32
    %19 = arith.cmpi eq, %arg1, %c0_i32_22 : i32
    %20 = arith.extui %19 : i1 to i32
    %c0_i32_23 = arith.constant 0 : i32
    %21 = arith.cmpi ne, %20, %c0_i32_23 : i32
    scf.if %21 {
      %c0_24 = arith.constant 0 : index
      %c0_25 = arith.constant 0 : index
      %22 = vector.load %arg10[%c0_24, %c0_25] : memref<8x256xf32, #tpu.memory_space<vmem>>, vector<8x256xf32>
      %cst = arith.constant dense<0.000000e+00> : vector<8xf32>
      %23 = vector.multi_reduction <add>, %22, %cst [1] : vector<8x256xf32> to vector<8xf32>
      %24 = vector.shape_cast %23 : vector<8xf32> to vector<8x1xf32>
      %cst_26 = arith.constant 3.906250e-03 : f32
      %25 = vector.broadcast %cst_26 : f32 to vector<8x1xf32>
      %26 = arith.mulf %24, %25 : vector<8x1xf32>
      %c0_27 = arith.constant 0 : index
      %c0_28 = arith.constant 0 : index
      %27 = vector.load %arg12[%c0_27, %c0_28] : memref<8x256xf32, #tpu.memory_space<vmem>>, vector<8x256xf32>
      %cst_29 = arith.constant dense<0xFF800000> : vector<8xf32>
      %28 = vector.multi_reduction <maximumf>, %27, %cst_29 [1] : vector<8x256xf32> to vector<8xf32>
      %29 = vector.shape_cast %28 : vector<8xf32> to vector<8x1xf32>
      %30 = arith.addf %26, %29 : vector<8x1xf32>
      %c0_30 = arith.constant 0 : index
      %c0_31 = arith.constant 0 : index
      %31 = vector.load %arg11[%c0_30, %c0_31] : memref<8x256xf32, #tpu.memory_space<vmem>>, vector<8x256xf32>
      %cst_32 = arith.constant dense<0.000000e+00> : vector<8xf32>
      %32 = vector.multi_reduction <add>, %31, %cst_32 [1] : vector<8x256xf32> to vector<8xf32>
      %33 = vector.shape_cast %32 : vector<8xf32> to vector<8x1xf32>
      %cst_33 = arith.constant 3.906250e-03 : f32
      %34 = vector.broadcast %cst_33 : f32 to vector<8x1xf32>
      %35 = arith.mulf %33, %34 : vector<8x1xf32>
      %c0_34 = arith.constant 0 : index
      %c0_35 = arith.constant 0 : index
      %36 = vector.load %arg13[%c0_34, %c0_35] : memref<8x256xf32, #tpu.memory_space<vmem>>, vector<8x256xf32>
      %cst_36 = arith.constant dense<0xFF800000> : vector<8xf32>
      %37 = vector.multi_reduction <maximumf>, %36, %cst_36 [1] : vector<8x256xf32> to vector<8xf32>
      %38 = vector.shape_cast %37 : vector<8xf32> to vector<8x1xf32>
      %39 = arith.addf %35, %38 : vector<8x1xf32>
      %c0_37 = arith.constant 0 : index
      %c0_38 = arith.constant 0 : index
      %40 = vector.load %arg4[%c0_37, %c0_38] : memref<8x4xf32, #tpu.memory_space<vmem>>, vector<8x4xf32>
      %41 = vector.broadcast %30 : vector<8x1xf32> to vector<8x4xf32>
      %42 = arith.mulf %40, %41 : vector<8x4xf32>
      %c0_39 = arith.constant 0 : index
      %c0_40 = arith.constant 0 : index
      %43 = vector.load %arg5[%c0_39, %c0_40] : memref<8x4xf32, #tpu.memory_space<vmem>>, vector<8x4xf32>
      %44 = vector.broadcast %39 : vector<8x1xf32> to vector<8x4xf32>
      %45 = arith.mulf %43, %44 : vector<8x4xf32>
      %46 = arith.addf %42, %45 : vector<8x4xf32>
      %cst_41 = arith.constant dense<0.000000e+00> : vector<4xf32>
      %47 = vector.multi_reduction <add>, %46, %cst_41 [0] : vector<8x4xf32> to vector<4xf32>
      %48 = vector.shape_cast %47 : vector<4xf32> to vector<1x4xf32>
      %c0_42 = arith.constant 0 : index
      %c0_43 = arith.constant 0 : index
      %49 = vector.load %arg6[%c0_42, %c0_43] : memref<1x4xf32, #tpu.memory_space<vmem>>, vector<1x4xf32>
      %50 = arith.addf %48, %49 : vector<1x4xf32>
      %c0_44 = arith.constant 0 : index
      %c0_45 = arith.constant 0 : index
      %51 = vector.load %arg7[%c0_44, %c0_45] : memref<8x4xf32, #tpu.memory_space<vmem>>, vector<8x4xf32>
      %52 = vector.broadcast %50 : vector<1x4xf32> to vector<8x4xf32>
      %53 = arith.mulf %51, %52 : vector<8x4xf32>
      %cst_46 = arith.constant dense<0.000000e+00> : vector<8xf32>
      %54 = vector.multi_reduction <add>, %53, %cst_46 [1] : vector<8x4xf32> to vector<8xf32>
      %55 = vector.shape_cast %54 : vector<8xf32> to vector<8x1xf32>
      %c0_47 = arith.constant 0 : index
      %c0_48 = arith.constant 0 : index
      %56 = vector.load %arg8[%c0_47, %c0_48] : memref<8x1xf32, #tpu.memory_space<vmem>>, vector<8x1xf32>
      %57 = arith.addf %55, %56 : vector<8x1xf32>
      %58 = arith.negf %57 : vector<8x1xf32>
      %59 = math.exp %58 : vector<8x1xf32>
      %cst_49 = arith.constant 1.000000e+00 : f32
      %60 = vector.broadcast %cst_49 : f32 to vector<8x1xf32>
      %61 = arith.addf %60, %59 : vector<8x1xf32>
      %62 = arith.divf %60, %61 : vector<8x1xf32>
      %c0_50 = arith.constant 0 : index
      %c0_51 = arith.constant 0 : index
      %c0_52 = arith.constant 0 : index
      %63 = vector.load %arg9[%c0_50, %c0_51, %c0_52] : memref<1x8x1xf32, #tpu.memory_space<vmem>>, vector<1x8x1xf32>
      %64 = vector.shape_cast %63 : vector<1x8x1xf32> to vector<8x1xf32>
      %65 = vector.shape_cast %62 : vector<8x1xf32> to vector<1x8x1xf32>
      tpu.vector_store %arg9[%c0_50, %c0_51, %c0_52], %65 {strides = array<i32>} : memref<1x8x1xf32, #tpu.memory_space<vmem>>, vector<1x8x1xf32>,
    } else {
    }
    return
  }
  func.func @transform_0(%arg0: i32, %arg1: i32) -> (i32, i32, i32) {
    %c0_i32 = arith.constant 0 : i32
    %c0_i32_0 = arith.constant 0 : i32
    return %arg0, %c0_i32, %arg1 : i32, i32, i32
  }
  func.func @transform_1(%arg0: i32, %arg1: i32) -> (i32, i32, i32) {
    %c0_i32 = arith.constant 0 : i32
    %c0_i32_0 = arith.constant 0 : i32
    return %arg0, %c0_i32, %arg1 : i32, i32, i32
  }
  func.func @transform_2(%arg0: i32, %arg1: i32) -> (i32, i32) {
    %c0_i32 = arith.constant 0 : i32
    %c0_i32_0 = arith.constant 0 : i32
    %c0_i32_1 = arith.constant 0 : i32
    return %c0_i32, %c0_i32_0 : i32, i32
  }
  func.func @transform_3(%arg0: i32, %arg1: i32) -> (i32, i32) {
    %c0_i32 = arith.constant 0 : i32
    %c0_i32_0 = arith.constant 0 : i32
    %c0_i32_1 = arith.constant 0 : i32
    return %c0_i32, %c0_i32_0 : i32, i32
  }
  func.func @transform_4(%arg0: i32, %arg1: i32) -> (i32, i32) {
    %c0_i32 = arith.constant 0 : i32
    %c0_i32_0 = arith.constant 0 : i32
    %c0_i32_1 = arith.constant 0 : i32
    return %c0_i32, %c0_i32_0 : i32, i32
  }
  func.func @transform_5(%arg0: i32, %arg1: i32) -> (i32, i32) {
    %c0_i32 = arith.constant 0 : i32
    %c0_i32_0 = arith.constant 0 : i32
    %c0_i32_1 = arith.constant 0 : i32
    return %c0_i32, %c0_i32_0 : i32, i32
  }
  func.func @transform_6(%arg0: i32, %arg1: i32) -> (i32, i32) {
    %c0_i32 = arith.constant 0 : i32
    %c0_i32_0 = arith.constant 0 : i32
    %c0_i32_1 = arith.constant 0 : i32
    return %c0_i32, %c0_i32_0 : i32, i32
  }
  func.func @transform_7(%arg0: i32, %arg1: i32) -> (i32, i32, i32) {
    %c0_i32 = arith.constant 0 : i32
    %c0_i32_0 = arith.constant 0 : i32
    %c0_i32_1 = arith.constant 0 : i32
    return %arg0, %c0_i32, %c0_i32_0 : i32, i32, i32
  }
}

</mosaic_0001>

<bundles_post_ra>
// kernel: mcff_forward.3
= control target key start
LH: loop header
LB: loop body
LE: loop exit
PB: predicated region body
PF: predicated region fallthrough
CT: control target
= control target key end

     0   :  { %s492_s12 = smov 0   ;;  %s494_s13 = smov 0   ;;  %s531_s0 = inlined_call_operand.vmem [shape: f32[2,8,256], index: 0, kind: input, shape index: {}]   ;;  %s532_s1 = inlined_call_operand.vmem [shape: f32[2,8,256], index: 1, kind: input, shape index: {}]   ;;  %s533_s2 = inlined_call_operand.vmem [shape: f32[2,8,1], index: 2, kind: input, shape index: {}]   ;;  %s534_s3 = inlined_call_operand.vmem [shape: f32[2,8,256], index: 3, kind: output, shape index: {}]  }
   0x1   :  { %s496_s14 = smov 0  }
   0x2 LB: > { %s25_s15 = sadd.s32 1, %s465_s13  ;;  %p408_p0 = scmp.ge.s32.totalorder %s469_s14, 1  ;;  %s469_s14 = sphi %s496_s14, %s13_s14   ;;  %s465_s13 = sphi %s494_s13, %s536_s13   ;;  %s461_s12 = sphi %s492_s12, %s535_s12  }
   0x3   : > { %p27_p1 = scmp.ge.s32.totalorder %s25_s15, 2  ;;  %p184_p2 = scmp.lt.s32.totalorder %s469_s14, 3 }
   0x5   : > { %s538_s15 = smov (%p27_p1, %s25_s15), 0  ;;  %p185_p3 = pnand %p408_p0, %p184_p2 }
   0x6   : > { %p230_p4 = scmp.lt.s32.totalorder (!%p185_p3), %s461_s12, 1  ;;  %v471_v0 = vmov (!%p185_p3), 0  }
   0x7   : > { %188 = sbr.rel (%p185_p3) target bundleno = 155 (0x9b), region = 32  ;;  %446 = vset.pattern.permute.xlu0 (!%p185_p3), %v471_v0 }
   0xe   : > { %s540_s12 = smov (!%p230_p4, %s461_s12), 1 }
   0xf   : > { %s413_s16 = sshll.u32 %s540_s12, 3  ;;  %s418_s20 = sshll.u32 %s540_s12, 4 }
  0x10   : > { %s252_s19 = scalar_lea.vmem %s533_s2, %s413_s16  ;;  %s237_s23 = scalar_lea.vmem %s531_s0, %s418_s20 }
  0x11   : > { %v263_v1 = vld [vmem:[%s252_s19] sm:$0xff]  ;;  %s247_s26 = scalar_lea.vmem %s532_s1, %s418_s20  ;;  %v265_v5 = vld [vmem:[%s237_s23 + $0x8] sm:$0xff]  ;;  %s261_s29 = scalar_lea.vmem %s534_s3, %s418_s20 }
  0x12   : > { %270 = vperm.xlu0 %446, %v263_v1   ;;  %v275_v2 = vsub.f32 1.0, %v263_v1  ;;  %v264_v4 = vld [vmem:[%s237_s23] sm:$0xff]  ;;  %v267_v7 = vld [vmem:[%s247_s26 + $0x8] sm:$0xff] }
  0x13   : > { %v266_v6 = vld [vmem:[%s247_s26] sm:$0xff] }
  0x16   : > { %278 = vperm.xlu0 %446, %v275_v2  }
  0x91   : > { %v271_v3 = vpop.permute.xlu0 %270 }
  0x92   : > { %v273_v9 = vmul.f32 %v271_v3, %v264_v4  ;;  %v274_v10 = vmul.f32 %v271_v3, %v265_v5 }
  0x95   : > { %v279_v8 = vpop.permute.xlu0 %278 }
  0x96   : > { %v281_v11 = vmul.f32 %v279_v8, %v266_v6  ;;  %v282_v12 = vmul.f32 %v279_v8, %v267_v7 }
  0x98   : > { %v283_v13 = vadd.f32 %v281_v11, %v273_v9  ;;  %v284_v14 = vadd.f32 %v282_v12, %v274_v10 }
  0x9a   : > { %285 = vst [vmem:[%s261_s29] sm:$0xff] %v283_v13  ;;  %286 = vst [vmem:[%s261_s29 + $0x8] sm:$0xff] %v284_v14 }
  0x9b PF: > { %s13_s14 = sadd.s32 1, %s469_s14   ;;  %s535_s12 = smov %s465_s13 }
  0x9c   : > { %p10_p5 = scmp.ge.s32.totalorder %s13_s14, 4   ;;  %s536_s13 = smov %s538_s15 }
  0x9e   :  { %12 = sbr.rel (!%p10_p5) target bundleno = 2 (0x2), region = 68 }

// kernel: mcff_forward.2
= control target key start
LH: loop header
LB: loop body
LE: loop exit
PB: predicated region body
PF: predicated region fallthrough
CT: control target
= control target key end

     0   :  { %s634_s24 = smov 0   ;;  %s636_s25 = smov 0   ;;  %s691_s0 = inlined_call_operand.vmem [shape: f32[2,8,256], index: 0, kind: input, shape index: {}]   ;;  %s692_s1 = inlined_call_operand.vmem [shape: f32[2,8,256], index: 1, kind: input, shape index: {}]   ;;  %s693_s2 = inlined_call_operand.vmem [shape: f32[8,4], index: 2, kind: input, shape index: {}]   ;;  %s694_s3 = inlined_call_operand.vmem [shape: f32[8,4], index: 3, kind: input, shape index: {}]   ;;  %s695_s4 = inlined_call_operand.vmem [shape: f32[1,4], index: 4, kind: input, shape index: {}]   ;;  %s696_s5 = inlined_call_operand.vmem [shape: f32[8,4], index: 5, kind: input, shape index: {}]   ;;  %s697_s6 = inlined_call_operand.vmem [shape: f32[8,1], index: 6, kind: input, shape index: {}]   ;;  %s698_s7 = inlined_call_operand.vmem [shape: f32[2,8,1], index: 7, kind: output, shape index: {}]  }
   0x1   :  { %s638_s26 = smov 0  }
   0x2 LB: > { %s29_s27 = sadd.s32 1, %s588_s25  ;;  %p531_p0 = scmp.ge.s32.totalorder %s592_s26, 1  ;;  %s592_s26 = sphi %s638_s26, %s17_s26   ;;  %s588_s25 = sphi %s636_s25, %s700_s25   ;;  %s584_s24 = sphi %s634_s24, %s699_s24  }
   0x3   : > { %p31_p1 = scmp.ge.s32.totalorder %s29_s27, 2  ;;  %p273_p2 = scmp.lt.s32.totalorder %s592_s26, 3 }
   0x5   : > { %s702_s27 = smov (%p31_p1, %s29_s27), 0  ;;  %p274_p3 = pnand %p531_p0, %p273_p2 }
   0x6   : > { %p318_p4 = scmp.lt.s32.totalorder (!%p274_p3), %s584_s24, 1  ;;  %v408_v15 = vld [vmem:[%s693_s2] sm:$0xff] (!%p274_p3)  ;;  %vm413_vm0 = vcmask (!%p274_p3), 31744   ;;  %v424_v24 = vlaneseq (!%p274_p3)  ;;  %vm440_vm1 = vcmask (!%p274_p3), 7168  }
   0x7   : > { %277 = sbr.rel (%p274_p3) target bundleno = 365 (0x16d), region = 48  ;;  %v410_v16 = vld [vmem:[%s694_s3] sm:$0xff] (!%p274_p3) }
   0x8   : > { %v425_v27 = vshrl.u32 (!%p274_p3), %v424_v24, 7  ;;  %v421_v29 = vld [vmem:[%s695_s4] sm:$0x1] (!%p274_p3) }
   0x9   : > { %v423_v33 = vld [vmem:[%s696_s5] sm:$0xff] (!%p274_p3) }
   0xa   : > { %v426_v31 = vsub.s32 (!%p274_p3), 0, %v425_v27  ;;  %v432_v37 = vld [vmem:[%s697_s6] sm:$0xff] (!%p274_p3) }
   0xe   : > { %s704_s24 = smov (!%p318_p4, %s584_s24), 1 }
   0xf   : > { %s540_s28 = sshll.u32 %s704_s24, 4  ;;  %s536_s22 = sshll.u32 %s704_s24, 3 }
  0x10   : > { %s325_s8 = scalar_lea.vmem %s691_s0, %s540_s28  ;;  %s335_s11 = scalar_lea.vmem %s692_s1, %s540_s28 }
  0x11   : > { %v353_v0 = vld [vmem:[%s325_s8] sm:$0xff]  ;;  %v354_v1 = vld [vmem:[%s325_s8 + $0x8] sm:$0xff]  ;;  %s340_s29 = scalar_lea.vmem %s698_s7, %s536_s22 }
  0x12   : > { %v386_v2 = vadd.f32 %v354_v1, %v353_v0  ;;  %v392_v3 = vmax.f32 %v353_v0, %v354_v1  ;;  %v355_v4 = vld [vmem:[%s335_s11] sm:$0xff]  ;;  %v356_v5 = vld [vmem:[%s335_s11 + $0x8] sm:$0xff] }
  0x13   : > { %v398_v6 = vadd.f32 %v356_v5, %v355_v4  ;;  %v404_v7 = vmax.f32 %v355_v4, %v356_v5 }
  0x14   : > { %387 = vadd.xlane.f32.xlu0 %v386_v2  ;;  %393 = vmax.xlane.f32.xlu1 %v392_v3 }
  0x18   : > { %399 = vadd.xlane.f32.xlu0 %v398_v6  ;;  %405 = vmax.xlane.f32.xlu1 %v404_v7 }
  0xa1   : > { %v388_v8 = vpop.xlane.xlu0 %387  ;;  %v394_v9 = vpop.xlane.xlu1 %393 }
  0xa2   : > { %v389_v10 = vmul.f32 0.00390625, %v388_v8 }
  0xa4   : > { %v395_v13 = vadd.f32 %v394_v9, %v389_v10 }
  0xa5   : > { %v400_v11 = vpop.xlane.xlu0 %399  ;;  %v406_v12 = vpop.xlane.xlu1 %405 }
  0xa6   : > { %v401_v14 = vmul.f32 0.00390625, %v400_v11  ;;  %v409_v18 = vmul.f32 %v408_v15, %v395_v13 }
  0xa8   : > { %v407_v17 = vadd.f32 %v406_v12, %v401_v14 }
  0xaa   : > { %v411_v19 = vmul.f32 %v410_v16, %v407_v17 }
  0xac   : > { %v412_v20 = vadd.f32 %v411_v19, %v409_v18 }
  0xae   : > { %v414_v21 = vsel %vm413_vm0, %v412_v20, 0.0 }
  0xaf   : > { %v415_v22 = vrot.slane %v414_v21, 4 }
  0xb1   : > { %v416_v23 = vadd.f32 %v415_v22, %v414_v21 }
  0xb3   : > { %v417_v25 = vrot.slane %v416_v23, 2 }
  0xb5   : > { %v418_v26 = vadd.f32 %v417_v25, %v416_v23 }
  0xb7   : > { %v419_v28 = vrot.slane %v418_v26, 1 }
  0xb9   : > { %v420_v30 = vadd.f32 %v419_v28, %v418_v26 }
  0xbb   : > { %v422_v32 = vadd.f32 %v421_v29, %v420_v30 }
  0xbd   : > { %v427_v34 = vrot.slane %v422_v32, %v426_v31 }
  0xbf   : > { %v428_v35 = vmul.f32 %v427_v34, %v423_v33 }
  0xc1   : > { %v429_v36 = vsel %vm413_vm0, %v428_v35, 0.0 }
  0xc2   : > { %430 = vadd.xlane.f32.xlu0 %v429_v36 }
 0x14f   : > { %v431_v38 = vpop.xlane.xlu0 %430 }
 0x150   : > { %v433_v39 = vadd.f32 %v432_v37, %v431_v38 }
 0x152   : > { %v537_v40 = vmul.f32 -1.442695, %v433_v39 }
 0x154   : > { %566 = vpow2.f32 %v537_v40 }
 0x15e   : > { %v567_v41 = vpop.eup %566 }
 0x15f   : > { %v437_v42 = vadd.f32 1.0, %v567_v41 }
 0x161   : > { %568 = vrcp.f32 %v437_v42 }
 0x16b   : > { %v569_v43 = vpop.eup %568 }
 0x16c   : > { %441 = vst.msk [vmem:[%s340_s29] sm:$0xff] %vm440_vm1, %v569_v43 }
 0x16d PF: > { %s17_s26 = sadd.s32 1, %s592_s26   ;;  %s699_s24 = smov %s588_s25 }
 0x16e   : > { %p14_p5 = scmp.ge.s32.totalorder %s17_s26, 4   ;;  %s700_s25 = smov %s702_s27 }
 0x170   :  { %16 = sbr.rel (!%p14_p5) target bundleno = 2 (0x2), region = 89 }

</bundles_post_ra>
